<compile_context>
chip_gen: v6e
topology: v6e:2x2x1
jax: 0.10.0
libtpu: 0.0.40
codegen_flags: <defaults>
</compile_context>

<pallas_src>
import math
from functools import partial

import jax
import jax.numpy as jnp
from jax.experimental import pallas as pl
from jax.experimental.pallas import tpu as pltpu


# ----------------------------------------------------------------------------
# Tile-selection helpers
# ----------------------------------------------------------------------------
def _round_up(x, m):
    return ((x + m - 1) // m) * m


def _pick_col_tile(dim, target, align=128):
    """Largest tile <= target that divides `dim` and is a multiple of `align`,
    else the full dim (full-extent blocks are always layout-legal)."""
    if dim <= target:
        return dim
    t = (target // align) * align
    while t >= align:
        if dim % t == 0:
            return t
        t -= align
    return dim


def _pick_row_tile(m, target, align):
    """Row (M) tile: a multiple of `align`.  Prefer the largest tile <= target
    whose zero-padding overhead is <= 1/16 of m; otherwise accept padding at
    the target tile (padding a few rows is far cheaper than re-streaming the
    3*D^2 weights with a collapsed row tile)."""
    target = max(align, (target // align) * align)
    if m <= target:
        return max(align, _round_up(m, align))
    t = target
    while t >= align:
        if (_round_up(m, t) - m) * 16 <= m:
            return t
        t -= align
    return target


def _vmem_capacity_bytes():
    try:
        return int(pltpu.get_tpu_info().vmem_capacity_bytes)
    except Exception:
        return 64 << 20  # conservative (v7x-sized) fallback


# ----------------------------------------------------------------------------
# Kernel
# ----------------------------------------------------------------------------
def _wqkv_pe_kernel(x_ref, p_ref, wp_ref, w_ref,
                    q_ref, k_ref, v_ref,
                    h_ref, accq_ref, acck_ref, accv_ref):
    # Grid = (M/TM, D/TN, D/TK); the K-reduction axis (kk) is innermost.
    #   x_ref:  (TM, TK)      x[i-tile, k-tile]
    #   p_ref:  (TM, P)       p[i-tile, :]
    #   wp_ref: (P,  TK)      Wp.weight.T[:, k-tile]
    #   w_ref:  (3, TK, TN)   stacked (Wq|Wk|Wv).weight.T tiles
    #   q/k/v_ref: (TM, TN)   output tiles
    #   h_ref:  (KT, TM, TK)  cached h row-block (compute dtype)
    #   acc*_ref: (TM, TN)    f32 accumulators (resident across kk)
    n = pl.program_id(1)
    kk = pl.program_id(2)

    @pl.when(kk == 0)
    def _init():
        accq_ref[...] = jnp.zeros_like(accq_ref)
        acck_ref[...] = jnp.zeros_like(acck_ref)
        accv_ref[...] = jnp.zeros_like(accv_ref)

    # h tile = x[i-tile, k-tile] + p[i-tile, :] @ wp[:, k-tile].  Computed once
    # per (row-tile, k-tile) and cached across the N axis (n is "arbitrary",
    # so every core that reads the cache also executed this fill).
    @pl.when(n == 0)
    def _fill_h():
        p_proj = jnp.dot(p_ref[...], wp_ref[...],
                         preferred_element_type=jnp.float32)
        h_new = x_ref[...].astype(jnp.float32) + p_proj
        h_ref[kk] = h_new.astype(h_ref.dtype)

    h = h_ref[kk]
    accq_ref[...] += jnp.dot(h, w_ref[0], preferred_element_type=jnp.float32)
    acck_ref[...] += jnp.dot(h, w_ref[1], preferred_element_type=jnp.float32)
    accv_ref[...] += jnp.dot(h, w_ref[2], preferred_element_type=jnp.float32)

    @pl.when(kk == pl.num_programs(2) - 1)
    def _store():
        q_ref[...] = accq_ref[...].astype(q_ref.dtype)
        k_ref[...] = acck_ref[...].astype(k_ref.dtype)
        v_ref[...] = accv_ref[...].astype(v_ref.dtype)


# ----------------------------------------------------------------------------
# Wrapper
# ----------------------------------------------------------------------------
def fused_wqkv_with_pe(x, p, wp_t, wqkv_t, nhead, use_flash_attn=True,
                       compute_dtype=jnp.bfloat16, tm=None, tn=None, tk=None,
                       weight_buffer_count=None):
    """Returns (q, k, v) matching FusedWQKVwithPE.forward.

    x:      (B, S, d_model)
    p:      (B, S, p_dim)
    wp_t:   (p_dim, d_model)                    == Wp.weight.T
    wqkv_t: (d_model, 3*d_model) == Wqkv.weight.T, or pre-stacked (3, D, D)
            with wqkv_t[j] == Wqkv.weight.T[:, j*D:(j+1)*D] (hoists the per-call
            split/transpose out of the jitted path).
    compute_dtype: matmul dtype (default bf16; accumulation is always f32);
            q/k/v are returned in x's original dtype.
    """
    B, S, D = x.shape
    P = p.shape[-1]
    assert wp_t.shape == (P, D)
    assert D % nhead == 0
    hd = D // nhead

    out_dtype = x.dtype                       # record BEFORE the compute cast
    if compute_dtype is None:
        compute_dtype = x.dtype
    compute_dtype = jnp.dtype(compute_dtype)

    x = x.astype(compute_dtype)
    p = p.astype(compute_dtype)
    wp_t = wp_t.astype(compute_dtype)
    if wqkv_t.ndim == 3:
        assert wqkv_t.shape == (3, D, D)
        w3 = wqkv_t.astype(compute_dtype)
    else:
        assert wqkv_t.shape == (D, 3 * D)
        w3 = wqkv_t.reshape(D, 3, D).transpose(1, 0, 2).astype(compute_dtype)

    # Flatten (B, S) -> M: rows are independent.
    M = B * S
    x2 = x.reshape(M, D)
    p2 = p.reshape(M, P)

    cs = jnp.dtype(compute_dtype).itemsize
    os_ = jnp.dtype(out_dtype).itemsize

    # Generation-aware defaults.
    phys_vmem = _vmem_capacity_bytes()
    big_vmem = phys_vmem >= (96 << 20)        # v5e / v6e (128 MiB) vs v7x (64 MiB)
    if tm is None:
        tm = 1024 if big_vmem else 512
    if tn is None:
        tn = 1024 if big_vmem else 512
    if tk is None:
        tk = 512

    row_align = max(8, 32 // cs)              # 8 rows f32 / 16 bf16 / 32 int8-fp8
    TM = _pick_row_tile(M, tm, row_align)
    TN = _pick_col_tile(D, tn, 128)
    TK = _pick_col_tile(D, tk, 128)
    KT = D // TK

    M_pad = _round_up(M, TM)
    if M_pad != M:
        x2 = jnp.pad(x2, ((0, M_pad - M), (0, 0)))
        p2 = jnp.pad(p2, ((0, M_pad - M), (0, 0)))

    # Advisory cost hint for XLA scheduling around the custom call.
    flops = 2 * M * (P * D + 3 * D * D)
    bytes_accessed = (cs * (M * D + M * P + P * D + 3 * D * D)
                      + os_ * 3 * M * D)
    cost = pl.CostEstimate(flops=flops, transcendentals=0,
                           bytes_accessed=bytes_accessed)

    # Scoped-VMEM budget: f32 accumulators + cached h row-block + double-
    # buffered in/out tiles (+30% margin).  v5e/v6e may use most of their
    # 128 MiB; v7x stays under its 64 MiB.
    need = (3 * TM * TN * 4                               # accumulators
            + KT * TM * TK * cs                           # cached h row-block
            + 2 * cs * (TM * TK + TM * P + P * TK + 3 * TK * TN)
            + 2 * os_ * 3 * TM * TN)
    gen_cap = (100 << 20) if big_vmem else (56 << 20)
    vmem_limit = int(1.3 * need) + (4 << 20)
    vmem_limit = min(max(vmem_limit, 32 << 20), gen_cap)

    grid = (M_pad // TM, D // TN, KT)
    out_sds = jax.ShapeDtypeStruct((M_pad, D), out_dtype)

    # Optional deeper buffering for the weight stream (useful on v7x if the
    # weight DMA is still exposed at TM=512); off by default.
    w_spec_kwargs = {}
    if weight_buffer_count is not None:
        w_spec_kwargs["pipeline_mode"] = pl.Buffered(weight_buffer_count)
    w_spec = pl.BlockSpec((3, TK, TN), lambda i, n, kk: (0, kk, n),
                          **w_spec_kwargs)

    q2d, k2d, v2d = pl.pallas_call(
        _wqkv_pe_kernel,
        out_shape=(out_sds, out_sds, out_sds),
        grid_spec=pltpu.PrefetchScalarGridSpec(
            num_scalar_prefetch=0,
            grid=grid,
            in_specs=[
                pl.BlockSpec((TM, TK), lambda i, n, kk: (i, kk)),   # x
                pl.BlockSpec((TM, P), lambda i, n, kk: (i, 0)),     # p
                pl.BlockSpec((P, TK), lambda i, n, kk: (0, kk)),    # Wp.T
                w_spec,                                             # (Wq|Wk|Wv).T
            ],
            out_specs=(
                pl.BlockSpec((TM, TN), lambda i, n, kk: (i, n)),    # q
                pl.BlockSpec((TM, TN), lambda i, n, kk: (i, n)),    # k
                pl.BlockSpec((TM, TN), lambda i, n, kk: (i, n)),    # v
            ),
            scratch_shapes=[
                pltpu.VMEM((KT, TM, TK), compute_dtype),   # cached h row-block
                pltpu.VMEM((TM, TN), jnp.float32),         # acc q
                pltpu.VMEM((TM, TN), jnp.float32),         # acc k
                pltpu.VMEM((TM, TN), jnp.float32),         # acc v
            ],
        ),
        compiler_params=pltpu.CompilerParams(
            # n must be "arbitrary": the h-cache is filled at n == 0 and read
            # for n > 0, so that axis cannot be sharded across TensorCores.
            dimension_semantics=("parallel", "arbitrary", "arbitrary"),
            vmem_limit_bytes=vmem_limit,
        ),
        cost_estimate=cost,
    )(x2, p2, wp_t, w3)

    # Head split.  Flash layout ('b s (h d)' -> 'b s h d') is a free reshape;
    # the non-flash 'b h s d' layout needs one XLA transpose.
    def _split(t):
        t = t[:M].reshape(B, S, nhead, hd)
        if not use_flash_attn:
            t = jnp.transpose(t, (0, 2, 1, 3))
        return t

    return _split(q2d), _split(k2d), _split(v2d)


# ----------------------------------------------------------------------------
# Pure-JAX reference (high-precision matmuls) and self-test
# ----------------------------------------------------------------------------
def _reference(x, p, wp_t, wqkv_t, nhead, use_flash_attn=True):
    hp = jax.lax.Precision.HIGHEST
    h = x + jnp.dot(p, wp_t, precision=hp)
    qkv = jnp.dot(h, wqkv_t, precision=hp)
    B, S, D = x.shape
    hd = D // nhead
    qkv = qkv.reshape(B, S, 3, nhead, hd)
    if use_flash_attn:
        qkv = jnp.transpose(qkv, (2, 0, 1, 3, 4))
    else:
        qkv = jnp.transpose(qkv, (2, 0, 3, 1, 4))
    return qkv[0], qkv[1], qkv[2]


def _make_inputs(key, B, S, D, P):
    kx, kp, kwp, kwqkv = jax.random.split(key, 4)
    x = jax.random.normal(kx, (B, S, D), dtype=jnp.float32)
    pe = jax.random.normal(kp, (B, S, P), dtype=jnp.float32)
    # Deterministic kaiming_uniform-style init (synthetic, not a checkpoint).
    wp_w = jax.random.uniform(kwp, (D, P), minval=-1.0 / math.sqrt(P),
                              maxval=1.0 / math.sqrt(P), dtype=jnp.float32)
    wqkv_w = jax.random.uniform(kwqkv, (3 * D, D), minval=-1.0 / math.sqrt(D),
                                maxval=1.0 / math.sqrt(D), dtype=jnp.float32)
    return x, pe, wp_w.T, wqkv_w.T          # Wp.weight.T, Wqkv.weight.T


def _check(q, k, v, refs, atol, rtol):
    for a, b in zip((q, k, v), refs):
        assert a.shape == b.shape
        assert jnp.allclose(a, b, atol=atol, rtol=rtol), "q/k/v mismatch"


if __name__ == "__main__":
    root_key = jax.random.PRNGKey(0)
    key1, key2 = jax.random.split(root_key, 2)

    # ---- Test 1: small module-consistent shapes, default bf16 compute. -----
    B, S, D, P, nhead = 2, 8, 32, 16, 4
    x, pe, wp_t, wqkv_t = _make_inputs(key1, B, S, D, P)
    # Hoisted one-time stacking of the fused weight (outside the jitted path).
    wqkv_stacked = wqkv_t.reshape(D, 3, D).transpose(1, 0, 2)

    for use_flash in (True, False):
        fn = jax.jit(partial(fused_wqkv_with_pe, nhead=nhead,
                             use_flash_attn=use_flash))
        q, k, v = fn(x, pe, wp_t, wqkv_stacked)
        jax.block_until_ready((q, k, v))
        assert q.dtype == x.dtype                     # outputs in original dtype
        refs = _reference(x, pe, wp_t, wqkv_t, nhead, use_flash)
        _check(q, k, v, refs, atol=5e-2, rtol=5e-2)   # bf16-compute tolerance

    # ---- Test 2: multi-tile grid (>=2 tiles on every grid axis) + padding. --
    B2, S2, D2, P2, nhead2 = 2, 41, 256, 64, 4        # M = 82 -> padded to 96
    x2, pe2, wp_t2, wqkv_t2 = _make_inputs(key2, B2, S2, D2, P2)
    refs2 = _reference(x2, pe2, wp_t2, wqkv_t2, nhead2, True)

    # f32 compute, tight-ish tolerance: exercises kk accumulation, n>0 h-cache
    # reads, row padding, and the in-call weight stacking path.
    fn32 = jax.jit(partial(fused_wqkv_with_pe, nhead=nhead2, use_flash_attn=True,
                           compute_dtype=jnp.float32, tm=32, tn=128, tk=128))
    q, k, v = fn32(x2, pe2, wp_t2, wqkv_t2)
    jax.block_until_ready((q, k, v))
    _check(q, k, v, refs2, atol=1e-2, rtol=1e-2)

    # Default bf16 compute on the same multi-tile grid.
    fnbf = jax.jit(partial(fused_wqkv_with_pe, nhead=nhead2, use_flash_attn=True,
                           tm=32, tn=128, tk=128))
    q, k, v = fnbf(x2, pe2, wp_t2, wqkv_t2)
    jax.block_until_ready((q, k, v))
    assert q.dtype == x2.dtype
    _check(q, k, v, refs2, atol=5e-2, rtol=5e-2)

    print("KERNEL_OK")
</pallas_src>

<mosaic_0001>
module attributes {stable_mosaic.version = 11 : i64} {
  func.func @_wqkv_pe_kernel(%arg0: i32, %arg1: i32, %arg2: i32, %arg3: memref<16x32xbf16, #tpu.memory_space<vmem>>, %arg4: memref<16x16xbf16, #tpu.memory_space<vmem>>, %arg5: memref<16x32xbf16, #tpu.memory_space<vmem>>, %arg6: memref<3x32x32xbf16, #tpu.memory_space<vmem>>, %arg7: memref<16x32xf32, #tpu.memory_space<vmem>>, %arg8: memref<16x32xf32, #tpu.memory_space<vmem>>, %arg9: memref<16x32xf32, #tpu.memory_space<vmem>>, %arg10: memref<1x16x32xbf16, #tpu.memory_space<vmem>>, %arg11: memref<16x32xf32, #tpu.memory_space<vmem>>, %arg12: memref<16x32xf32, #tpu.memory_space<vmem>>, %arg13: memref<16x32xf32, #tpu.memory_space<vmem>>) attributes {dimension_semantics = [#tpu.dimension_semantics<parallel>, #tpu.dimension_semantics<arbitrary>, #tpu.dimension_semantics<arbitrary>], iteration_bounds = array<i64: 1, 1, 1>, scalar_prefetch = 0 : i64, scratch_operands = 4 : i64, tpu.core_type = #tpu.core_type<tc>, window_params = [{transform_indices = @transform_0, window_bounds = array<i64: 16, 32>}, {transform_indices = @transform_1, window_bounds = array<i64: 16, 16>}, {transform_indices = @transform_2, window_bounds = array<i64: 16, 32>}, {transform_indices = @transform_3, window_bounds = array<i64: 3, 32, 32>}, {transform_indices = @transform_4, window_bounds = array<i64: 16, 32>}, {transform_indices = @transform_5, window_bounds = array<i64: 16, 32>}, {transform_indices = @transform_6, window_bounds = array<i64: 16, 32>}]} {
    %c0_i32 = arith.constant 0 : i32
    %0 = arith.cmpi eq, %arg2, %c0_i32 : i32
    %1 = arith.extui %0 : i1 to i32
    %c0_i32_0 = arith.constant 0 : i32
    %2 = arith.cmpi ne, %1, %c0_i32_0 : i32
    scf.if %2 {
      %cst_27 = arith.constant 0.000000e+00 : f32
      %30 = vector.broadcast %cst_27 : f32 to vector<16x32xf32>
      %c0_28 = arith.constant 0 : index
      %c0_29 = arith.constant 0 : index
      %31 = vector.load %arg11[%c0_28, %c0_29] : memref<16x32xf32, #tpu.memory_space<vmem>>, vector<16x32xf32>
      tpu.vector_store %arg11[%c0_28, %c0_29], %30 {strides = array<i32>} : memref<16x32xf32, #tpu.memory_space<vmem>>, vector<16x32xf32>,
      %cst_30 = arith.constant 0.000000e+00 : f32
      %32 = vector.broadcast %cst_30 : f32 to vector<16x32xf32>
      %c0_31 = arith.constant 0 : index
      %c0_32 = arith.constant 0 : index
      %33 = vector.load %arg12[%c0_31, %c0_32] : memref<16x32xf32, #tpu.memory_space<vmem>>, vector<16x32xf32>
      tpu.vector_store %arg12[%c0_31, %c0_32], %32 {strides = array<i32>} : memref<16x32xf32, #tpu.memory_space<vmem>>, vector<16x32xf32>,
      %cst_33 = arith.constant 0.000000e+00 : f32
      %34 = vector.broadcast %cst_33 : f32 to vector<16x32xf32>
      %c0_34 = arith.constant 0 : index
      %c0_35 = arith.constant 0 : index
      %35 = vector.load %arg13[%c0_34, %c0_35] : memref<16x32xf32, #tpu.memory_space<vmem>>, vector<16x32xf32>
      tpu.vector_store %arg13[%c0_34, %c0_35], %34 {strides = array<i32>} : memref<16x32xf32, #tpu.memory_space<vmem>>, vector<16x32xf32>,
    } else {
    }
    %c0_i32_1 = arith.constant 0 : i32
    %3 = arith.cmpi eq, %arg1, %c0_i32_1 : i32
    %4 = arith.extui %3 : i1 to i32
    %c0_i32_2 = arith.constant 0 : i32
    %5 = arith.cmpi ne, %4, %c0_i32_2 : i32
    scf.if %5 {
      %c0_27 = arith.constant 0 : index
      %c0_28 = arith.constant 0 : index
      %30 = vector.load %arg4[%c0_27, %c0_28] : memref<16x16xbf16, #tpu.memory_space<vmem>>, vector<16x16xbf16>
      %c0_29 = arith.constant 0 : index
      %c0_30 = arith.constant 0 : index
      %31 = vector.load %arg5[%c0_29, %c0_30] : memref<16x32xbf16, #tpu.memory_space<vmem>>, vector<16x32xbf16>
      %cst_31 = arith.constant dense<0.000000e+00> : vector<16x32xf32>
      %32 = tpu.matmul %30, %31, %cst_31 {dimension_numbers = #tpu.dot_dimension_numbers<[1], [0], [0], [1], [0, 0, 1, 1], [], []>} : vector<16x16xbf16>, vector<16x32xbf16>, vector<16x32xf32> -> vector<16x32xf32>
      %c0_32 = arith.constant 0 : index
      %c0_33 = arith.constant 0 : index
      %33 = vector.load %arg3[%c0_32, %c0_33] : memref<16x32xbf16, #tpu.memory_space<vmem>>, vector<16x32xbf16>
      %34 = arith.extf %33 : vector<16x32xbf16> to vector<16x32xf32>
      %35 = arith.addf %34, %32 : vector<16x32xf32>
      %36 = arith.truncf %35 : vector<16x32xf32> to vector<16x32xbf16>
      %37 = arith.index_cast %arg2 : i32 to index
      %c0_34 = arith.constant 0 : index
      %c0_35 = arith.constant 0 : index
      %38 = vector.load %arg10[%37, %c0_34, %c0_35] : memref<1x16x32xbf16, #tpu.memory_space<vmem>>, vector<1x16x32xbf16>
      %39 = vector.shape_cast %38 : vector<1x16x32xbf16> to vector<16x32xbf16>
      %40 = vector.shape_cast %36 : vector<16x32xbf16> to vector<1x16x32xbf16>
      tpu.vector_store %arg10[%37, %c0_34, %c0_35], %40 {strides = array<i32>} : memref<1x16x32xbf16, #tpu.memory_space<vmem>>, vector<1x16x32xbf16>,
    } else {
    }
    %6 = arith.index_cast %arg2 : i32 to index
    %c0 = arith.constant 0 : index
    %c0_3 = arith.constant 0 : index
    %7 = vector.load %arg10[%6, %c0, %c0_3] : memref<1x16x32xbf16, #tpu.memory_space<vmem>>, vector<1x16x32xbf16>
    %8 = vector.shape_cast %7 : vector<1x16x32xbf16> to vector<16x32xbf16>
    %c0_4 = arith.constant 0 : index
    %c0_5 = arith.constant 0 : index
    %9 = vector.load %arg11[%c0_4, %c0_5] : memref<16x32xf32, #tpu.memory_space<vmem>>, vector<16x32xf32>
    %c0_6 = arith.constant 0 : index
    %c0_7 = arith.constant 0 : index
    %c0_8 = arith.constant 0 : index
    %10 = vector.load %arg6[%c0_6, %c0_7, %c0_8] : memref<3x32x32xbf16, #tpu.memory_space<vmem>>, vector<1x32x32xbf16>
    %11 = vector.shape_cast %10 : vector<1x32x32xbf16> to vector<32x32xbf16>
    %cst = arith.constant dense<0.000000e+00> : vector<16x32xf32>
    %12 = tpu.matmul %8, %11, %cst {dimension_numbers = #tpu.dot_dimension_numbers<[1], [0], [0], [1], [0, 0, 1, 1], [], []>} : vector<16x32xbf16>, vector<32x32xbf16>, vector<16x32xf32> -> vector<16x32xf32>
    %13 = arith.addf %9, %12 : vector<16x32xf32>
    %c0_9 = arith.constant 0 : index
    %c0_10 = arith.constant 0 : index
    %14 = vector.load %arg11[%c0_9, %c0_10] : memref<16x32xf32, #tpu.memory_space<vmem>>, vector<16x32xf32>
    tpu.vector_store %arg11[%c0_9, %c0_10], %13 {strides = array<i32>} : memref<16x32xf32, #tpu.memory_space<vmem>>, vector<16x32xf32>,
    %c0_11 = arith.constant 0 : index
    %c0_12 = arith.constant 0 : index
    %15 = vector.load %arg12[%c0_11, %c0_12] : memref<16x32xf32, #tpu.memory_space<vmem>>, vector<16x32xf32>
    %c1 = arith.constant 1 : index
    %c0_13 = arith.constant 0 : index
    %c0_14 = arith.constant 0 : index
    %16 = vector.load %arg6[%c1, %c0_13, %c0_14] : memref<3x32x32xbf16, #tpu.memory_space<vmem>>, vector<1x32x32xbf16>
    %17 = vector.shape_cast %16 : vector<1x32x32xbf16> to vector<32x32xbf16>
    %cst_15 = arith.constant dense<0.000000e+00> : vector<16x32xf32>
    %18 = tpu.matmul %8, %17, %cst_15 {dimension_numbers = #tpu.dot_dimension_numbers<[1], [0], [0], [1], [0, 0, 1, 1], [], []>} : vector<16x32xbf16>, vector<32x32xbf16>, vector<16x32xf32> -> vector<16x32xf32>
    %19 = arith.addf %15, %18 : vector<16x32xf32>
    %c0_16 = arith.constant 0 : index
    %c0_17 = arith.constant 0 : index
    %20 = vector.load %arg12[%c0_16, %c0_17] : memref<16x32xf32, #tpu.memory_space<vmem>>, vector<16x32xf32>
    tpu.vector_store %arg12[%c0_16, %c0_17], %19 {strides = array<i32>} : memref<16x32xf32, #tpu.memory_space<vmem>>, vector<16x32xf32>,
    %c0_18 = arith.constant 0 : index
    %c0_19 = arith.constant 0 : index
    %21 = vector.load %arg13[%c0_18, %c0_19] : memref<16x32xf32, #tpu.memory_space<vmem>>, vector<16x32xf32>
    %c2 = arith.constant 2 : index
    %c0_20 = arith.constant 0 : index
    %c0_21 = arith.constant 0 : index
    %22 = vector.load %arg6[%c2, %c0_20, %c0_21] : memref<3x32x32xbf16, #tpu.memory_space<vmem>>, vector<1x32x32xbf16>
    %23 = vector.shape_cast %22 : vector<1x32x32xbf16> to vector<32x32xbf16>
    %cst_22 = arith.constant dense<0.000000e+00> : vector<16x32xf32>
    %24 = tpu.matmul %8, %23, %cst_22 {dimension_numbers = #tpu.dot_dimension_numbers<[1], [0], [0], [1], [0, 0, 1, 1], [], []>} : vector<16x32xbf16>, vector<32x32xbf16>, vector<16x32xf32> -> vector<16x32xf32>
    %25 = arith.addf %21, %24 : vector<16x32xf32>
    %c0_23 = arith.constant 0 : index
    %c0_24 = arith.constant 0 : index
    %26 = vector.load %arg13[%c0_23, %c0_24] : memref<16x32xf32, #tpu.memory_space<vmem>>, vector<16x32xf32>
    tpu.vector_store %arg13[%c0_23, %c0_24], %25 {strides = array<i32>} : memref<16x32xf32, #tpu.memory_space<vmem>>, vector<16x32xf32>,
    %c0_i32_25 = arith.constant 0 : i32
    %27 = arith.cmpi eq, %arg2, %c0_i32_25 : i32
    %28 = arith.extui %27 : i1 to i32
    %c0_i32_26 = arith.constant 0 : i32
    %29 = arith.cmpi ne, %28, %c0_i32_26 : i32
    scf.if %29 {
      %c0_27 = arith.constant 0 : index
      %c0_28 = arith.constant 0 : index
      %30 = vector.load %arg11[%c0_27, %c0_28] : memref<16x32xf32, #tpu.memory_space<vmem>>, vector<16x32xf32>
      %c0_29 = arith.constant 0 : index
      %c0_30 = arith.constant 0 : index
      %31 = vector.load %arg7[%c0_29, %c0_30] : memref<16x32xf32, #tpu.memory_space<vmem>>, vector<16x32xf32>
      tpu.vector_store %arg7[%c0_29, %c0_30], %30 {strides = array<i32>} : memref<16x32xf32, #tpu.memory_space<vmem>>, vector<16x32xf32>,
      %c0_31 = arith.constant 0 : index
      %c0_32 = arith.constant 0 : index
      %32 = vector.load %arg12[%c0_31, %c0_32] : memref<16x32xf32, #tpu.memory_space<vmem>>, vector<16x32xf32>
      %c0_33 = arith.constant 0 : index
      %c0_34 = arith.constant 0 : index
      %33 = vector.load %arg8[%c0_33, %c0_34] : memref<16x32xf32, #tpu.memory_space<vmem>>, vector<16x32xf32>
      tpu.vector_store %arg8[%c0_33, %c0_34], %32 {strides = array<i32>} : memref<16x32xf32, #tpu.memory_space<vmem>>, vector<16x32xf32>,
      %c0_35 = arith.constant 0 : index
      %c0_36 = arith.constant 0 : index
      %34 = vector.load %arg13[%c0_35, %c0_36] : memref<16x32xf32, #tpu.memory_space<vmem>>, vector<16x32xf32>
      %c0_37 = arith.constant 0 : index
      %c0_38 = arith.constant 0 : index
      %35 = vector.load %arg9[%c0_37, %c0_38] : memref<16x32xf32, #tpu.memory_space<vmem>>, vector<16x32xf32>
      tpu.vector_store %arg9[%c0_37, %c0_38], %34 {strides = array<i32>} : memref<16x32xf32, #tpu.memory_space<vmem>>, vector<16x32xf32>,
    } else {
    }
    return
  }
  func.func @transform_0(%arg0: i32, %arg1: i32, %arg2: i32) -> (i32, i32) {
    %c0_i32 = arith.constant 0 : i32
    return %arg0, %arg2 : i32, i32
  }
  func.func @transform_1(%arg0: i32, %arg1: i32, %arg2: i32) -> (i32, i32) {
    %c0_i32 = arith.constant 0 : i32
    %c0_i32_0 = arith.constant 0 : i32
    return %arg0, %c0_i32 : i32, i32
  }
  func.func @transform_2(%arg0: i32, %arg1: i32, %arg2: i32) -> (i32, i32) {
    %c0_i32 = arith.constant 0 : i32
    %c0_i32_0 = arith.constant 0 : i32
    return %c0_i32, %arg2 : i32, i32
  }
  func.func @transform_3(%arg0: i32, %arg1: i32, %arg2: i32) -> (i32, i32, i32) {
    %c0_i32 = arith.constant 0 : i32
    %c0_i32_0 = arith.constant 0 : i32
    return %c0_i32, %arg2, %arg1 : i32, i32, i32
  }
  func.func @transform_4(%arg0: i32, %arg1: i32, %arg2: i32) -> (i32, i32) {
    %c0_i32 = arith.constant 0 : i32
    return %arg0, %arg1 : i32, i32
  }
  func.func @transform_5(%arg0: i32, %arg1: i32, %arg2: i32) -> (i32, i32) {
    %c0_i32 = arith.constant 0 : i32
    return %arg0, %arg1 : i32, i32
  }
  func.func @transform_6(%arg0: i32, %arg1: i32, %arg2: i32) -> (i32, i32) {
    %c0_i32 = arith.constant 0 : i32
    return %arg0, %arg1 : i32, i32
  }
}

</mosaic_0001>

<bundles_post_ra>
// kernel: fused_wqkv_with_pe.1
= control target key start
LH: loop header
LB: loop body
LE: loop exit
PB: predicated region body
PF: predicated region fallthrough
CT: control target
= control target key end

     0   :  { %v429_v0 = vmov 0.0   ;;  %vm430_vm0 = vmmov 0   ;;  %vm51_vm1 = vcmask 130048   ;;  %vm25_vm2 = vcmask 261120   ;;  %s536_s2 = inlined_call_operand.vmem [shape: bf16[16,32], index: 2, kind: input, shape index: {}]   ;;  %s537_s1 = inlined_call_operand.vmem [shape: bf16[16,16], index: 1, kind: input, shape index: {}]   ;;  %s538_s3 = inlined_call_operand.vmem [shape: bf16[3,32,32], index: 3, kind: input, shape index: {}]   ;;  %s539_s0 = inlined_call_operand.vmem [shape: bf16[16,32], index: 0, kind: input, shape index: {}]   ;;  %s540_s4 = inlined_call_operand.vmem [shape: f32[16,32], index: 4, kind: output, shape index: {0}]   ;;  %s541_s5 = inlined_call_operand.vmem [shape: f32[16,32], index: 5, kind: output, shape index: {1}]   ;;  %s542_s6 = inlined_call_operand.vmem [shape: f32[16,32], index: 6, kind: output, shape index: {2}]  }
   0x1   :  { %388 = vmatprep.subr.bf16.mxu0 %v429_v0  ;;  %v420_v1 = vld [vmem:[%s536_s2] sm:$0xff]   ;;  %390 = vmatprep.mubr.msk.bf16.mxu0 %vm430_vm0, %v429_v0  ;;  %v422_v3 = vld [vmem:[%s538_s3 + $0x8] sm:$0xff]   ;;  %v423_v4 = vld [vmem:[%s538_s3 + $0x18] sm:$0xff]   ;;  %26 = vst.msk [vmem:[#allocation3] sm:$0xff] %vm25_vm2, %v429_v0  ;;  %vm113_vm3 = vcmask 257024  }
   0x2   :  { %v421_v2 = vld [vmem:[%s537_s1] sm:$0xff]   ;;  %394 = vmatprep.subr.bf16.mxu1 %v429_v0  ;;  %398 = vmatprep.mubr.msk.bf16.mxu1 %vm430_vm0, %v429_v0  ;;  %27 = vst.msk [vmem:[#allocation3 + $0x8] sm:$0xff] %vm25_vm2, %v429_v0  ;;  %28 = vst.msk [vmem:[#allocation4] sm:$0xff] %vm25_vm2, %v429_v0  ;;  %v425_v6 = vld [vmem:[%s538_s3 + $0x10] sm:$0xff]  }
   0x3   :  { %389 = vmatpush3.bf16.msra.mxu0 %v420_v1  ;;  %29 = vst.msk [vmem:[#allocation4 + $0x8] sm:$0xff] %vm25_vm2, %v429_v0  ;;  %30 = vst.msk [vmem:[#allocation5] sm:$0xff] %vm25_vm2, %v429_v0  ;;  %395 = vmatpush3.bf16.msra.mxu1 %v422_v3  ;;  %v424_v5 = vld [vmem:[%s538_s3] sm:$0xff]   ;;  %v427_v18 = vld [vmem:[%s538_s3 + $0x28] sm:$0xff]  }
   0x4   :  { %402 = vmatprep.subr.bf16.mxu0 %v429_v0  ;;  %31 = vst.msk [vmem:[#allocation5 + $0x8] sm:$0xff] %vm25_vm2, %v429_v0  ;;  %396 = vmatprep.subr.bf16.mxu1 %v429_v0  ;;  %v374_v7 = vld [vmem:[%s539_s0] sm:$0xff]  }
   0x5   :  { %v375_v8 = vunpack.c.l.bf16 %v374_v7  ;;  %v376_v11 = vunpack.c.h.bf16 %v374_v7  ;;  %v428_v20 = vld [vmem:[%s538_s3 + $0x20] sm:$0xff]  }
   0x6   :  { %391 = vmatmul.mubr.msk.bf16.vlgmr.msra.gmra.mxu0 %vm51_vm1, %v421_v2 }
   0x7   :  { %406 = vmatprep.mubr.msk.bf16.mxu0 %vm430_vm0, %v429_v0  ;;  %403 = vmatpush3.bf16.msra.mxu0 %v423_v4 }
   0x8   :  { %404 = vmatprep.subr.bf16.mxu0 %v429_v0  ;;  %397 = vmatpush3.bf16.msra.mxu1 %v424_v5  ;;  %v121_v21 = vld [vmem:[#allocation3] sm:$0xff] }
   0x9   :  { %410 = vmatprep.subr.bf16.mxu1 %v429_v0  ;;  %v193_v22 = vld [vmem:[#allocation4] sm:$0xff]  ;;  %v122_v29 = vld [vmem:[#allocation3 + $0x8] sm:$0xff] }
   0xa   :  { %v194_v30 = vld [vmem:[#allocation4 + $0x8] sm:$0xff]  ;;  %v257_v37 = vld [vmem:[#allocation5] sm:$0xff] }
   0xb   :  { %405 = vmatpush3.bf16.msra.mxu0 %v425_v6  ;;  %v258_v43 = vld [vmem:[#allocation5 + $0x8] sm:$0xff] }
  0xc6   :  { %v89_v9 = vpop.f32.mrf.mxu0 }
  0xc7   :  { %v100_v10 = vadd.f32 %v375_v8, %v89_v9 }
  0xc8   :  { %v392_v12 = vpop.f32.mrf.mxu0 }
  0xc9   :  { %v371_v13 = vpack.c.bf16 %v100_v10, %v100_v10 }
  0xca   :  { %v92_v14 = vpop.f32.mrf.mxu0 }
  0xcb   :  { %114 = vst.msk [vmem:[#allocation2] sm:$0xf] %vm113_vm3, %v371_v13  ;;  %v101_v15 = vadd.f32 %v376_v11, %v92_v14 }
  0xcc   :  { %v393_v16 = vpop.f32.mrf.mxu0 }
  0xcd   :  { %v372_v17 = vpack.c.bf16 %v101_v15, %v101_v15 }
  0xcf   :  { %115 = vst.msk [vmem:[#allocation2 + $0x4] sm:$0xf] %vm113_vm3, %v372_v17 }
  0xd6   :  { %v426_v19 = vld [vmem:[#allocation2] sm:$0xff]  }
  0xd7   :  { %399 = vmatmul.mubr.msk.bf16.vlgmr.msra.gmra.mxu1 %vm25_vm2, %v426_v19  ;;  %407 = vmatmul.mubr.msk.bf16.vlgmr.msra.gmra.mxu0 %vm25_vm2, %v426_v19 }
  0xd8   :  { %411 = vmatpush3.bf16.msra.mxu1 %v427_v18  ;;  %414 = vmatprep.mubr.msk.bf16.mxu1 %vm430_vm0, %v429_v0 }
  0xd9   :  { %412 = vmatprep.subr.bf16.mxu1 %v429_v0 }
  0xdc   :  { %413 = vmatpush3.bf16.msra.mxu1 %v428_v20 }
  0xdf   :  { %415 = vmatmul.mubr.msk.bf16.vlgmr.msra.gmra.mxu1 %vm25_vm2, %v426_v19 }
 0x197   :  { %v182_v23 = vpop.f32.mrf.mxu1  ;;  %v246_v24 = vpop.f32.mrf.mxu0 }
 0x198   :  { %v189_v25 = vadd.f32 %v182_v23, %v121_v21  ;;  %v253_v26 = vadd.f32 %v246_v24, %v193_v22 }
 0x199   :  { %v400_v27 = vpop.f32.mrf.mxu1  ;;  %v408_v28 = vpop.f32.mrf.mxu0 }
 0x19a   :  { %191 = vst.msk [vmem:[#allocation3] sm:$0xff] %vm25_vm2, %v189_v25  ;;  %255 = vst.msk [vmem:[#allocation4] sm:$0xff] %vm25_vm2, %v253_v26 }
 0x19b   :  { %v185_v31 = vpop.f32.mrf.mxu1  ;;  %v249_v32 = vpop.f32.mrf.mxu0 }
 0x19c   :  { %v190_v33 = vadd.f32 %v185_v31, %v122_v29  ;;  %v254_v34 = vadd.f32 %v249_v32, %v194_v30 }
 0x19d   :  { %v401_v35 = vpop.f32.mrf.mxu1  ;;  %v409_v36 = vpop.f32.mrf.mxu0 }
 0x19e   :  { %192 = vst.msk [vmem:[#allocation3 + $0x8] sm:$0xff] %vm25_vm2, %v190_v33  ;;  %256 = vst.msk [vmem:[#allocation4 + $0x8] sm:$0xff] %vm25_vm2, %v254_v34 }
 0x19f   :  { %v310_v38 = vpop.f32.mrf.mxu1 }
 0x1a0   :  { %v317_v39 = vadd.f32 %v310_v38, %v257_v37 }
 0x1a1   :  { %v324_v40 = vld [vmem:[#allocation3] sm:$0xff]  ;;  %v328_v41 = vld [vmem:[#allocation4] sm:$0xff]  ;;  %v416_v42 = vpop.f32.mrf.mxu1 }
 0x1a2   :  { %326 = vst.msk [vmem:[%s540_s4] sm:$0xff] %vm25_vm2, %v324_v40  ;;  %330 = vst.msk [vmem:[%s541_s5] sm:$0xff] %vm25_vm2, %v328_v41 }
 0x1a3   :  { %319 = vst.msk [vmem:[#allocation5] sm:$0xff] %vm25_vm2, %v317_v39  ;;  %v313_v44 = vpop.f32.mrf.mxu1 }
 0x1a4   :  { %v318_v45 = vadd.f32 %v313_v44, %v258_v43 }
 0x1a5   :  { %v325_v46 = vld [vmem:[#allocation3 + $0x8] sm:$0xff]  ;;  %v329_v47 = vld [vmem:[#allocation4 + $0x8] sm:$0xff]  ;;  %v417_v48 = vpop.f32.mrf.mxu1 }
 0x1a6   :  { %327 = vst.msk [vmem:[%s540_s4 + $0x8] sm:$0xff] %vm25_vm2, %v325_v46  ;;  %331 = vst.msk [vmem:[%s541_s5 + $0x8] sm:$0xff] %vm25_vm2, %v329_v47 }
 0x1a7   :  { %320 = vst.msk [vmem:[#allocation5 + $0x8] sm:$0xff] %vm25_vm2, %v318_v45 }
 0x1aa   :  { %v332_v49 = vld [vmem:[#allocation5] sm:$0xff] }
 0x1ab   :  { %334 = vst.msk [vmem:[%s542_s6] sm:$0xff] %vm25_vm2, %v332_v49 }
 0x1ae   :  { %v333_v50 = vld [vmem:[#allocation5 + $0x8] sm:$0xff] }
 0x1af   :  { %335 = vst.msk [vmem:[%s542_s6 + $0x8] sm:$0xff] %vm25_vm2, %v333_v50 }

</bundles_post_ra>
